<compile_context>
chip_gen: v6e
topology: v6e:2x2x1
jax: 0.10.0
libtpu: 0.0.40
codegen_flags: <defaults>
</compile_context>

<pallas_src>
import functools

import jax
import jax.numpy as jnp
from jax import lax
from jax.experimental import pallas as pl
from jax.experimental.pallas import tpu as pltpu

_SUBLANES = 8
_LANES = 128


def _knn_focal_like_kernel(gamma_ref, logits_ref, knn_ref, tgt_ref, out_ref,
                           *, n_rows, tile_n, tiles_per_split, num_splits):
    if num_splits > 1:
        p = pl.program_id(0)          # core split (CORE_PARALLEL on v7x)
        j = pl.program_id(1)          # row-tile reduction (arbitrary)
    else:
        p = 0
        j = pl.program_id(0)

    @pl.when(j == 0)
    def _init():
        out_ref[...] = jnp.zeros_like(out_ref)

    # HBM wire dtype preserved; upcast on-chip for compute.
    logits = logits_ref[...].astype(jnp.float32)             # (t, C)
    knn = knn_ref[...].astype(jnp.float32)                   # (t, C)
    tgt = tgt_ref[...]                                       # (t, 1) int32

    t, c = logits.shape
    col = lax.broadcasted_iota(jnp.int32, (t, c), 1)
    mask = col == tgt                                        # one-hot selector (bool)

    # Row max: the only remaining cross-lane (XLU) reduction.
    m = jnp.max(logits, axis=-1, keepdims=True)              # (t, 1)

    # --- Row sums on the MXU instead of the XLU -----------------------------
    # row_sum(x) = x @ ones.  x is split into exact bf16 hi/lo parts; the ones
    # RHS is exact in bf16, so two single-pass bf16 matmuls with f32
    # accumulation reproduce the f32 sum to ~2^-18 relative error while
    # keeping the MXU cost at 2 passes (vs. 6 for a full-precision f32 dot).
    ones_bf = jnp.ones((c, _LANES), jnp.bfloat16)

    def split_hi_lo(x):
        hi = x.astype(jnp.bfloat16)
        lo = (x - hi.astype(jnp.float32)).astype(jnp.bfloat16)
        return hi, lo

    def row_sum(hi, lo):
        s = jnp.dot(hi, ones_bf, preferred_element_type=jnp.float32)
        s = s + jnp.dot(lo, ones_bf, preferred_element_type=jnp.float32)
        return s[:, :1]                                      # (t, 1)

    exp_hi, exp_lo = split_hi_lo(jnp.exp(logits - m))
    log_hi, log_lo = split_hi_lo(logits)
    knn_hi, knn_lo = split_hi_lo(knn)

    sum_exp = row_sum(exp_hi, exp_lo)                                   # (t,1)
    logit_t = row_sum(jnp.where(mask, log_hi, 0), jnp.where(mask, log_lo, 0))
    knn_t = row_sum(jnp.where(mask, knn_hi, 0), jnp.where(mask, knn_lo, 0))
    knn_sum = row_sum(knn_hi, knn_lo)
    # -------------------------------------------------------------------------

    # per-row cross entropy: logsumexp(logits) - logits[target]
    ce = m + jnp.log(sum_exp) - logit_t                      # (t, 1)

    # knn probability of the true class (no [t, C] divide)
    p_t = knn_t * pl.reciprocal(knn_sum, approx=False)       # (t, 1)

    gamma = gamma_ref[0, 0]
    modulator = jnp.exp(gamma * jnp.log1p(-p_t))             # (1 - p_t)^gamma

    # Select (NOT multiply) so NaN/Inf from padded / duplicated rows never leaks.
    tile_idx = p * tiles_per_split + j
    row = tile_idx * tile_n + lax.broadcasted_iota(jnp.int32, (t, 1), 0)
    contrib = jnp.where(row < n_rows, ce * modulator, 0.0)

    out_ref[...] += jnp.sum(contrib)


def _device_config():
    """Generation-aware budgets: (vmem budget for tiling, vmem_limit_bytes, splits)."""
    kind = ""
    try:
        kind = jax.devices()[0].device_kind.lower()
    except Exception:
        pass

    budget, vmem_limit, num_splits = 8 << 20, None, 1
    if ("v5 lite" in kind) or ("v5e" in kind) or ("v5lite" in kind):
        budget, vmem_limit = 12 << 20, 16 << 20          # v5e: 16 MiB scoped default
    elif "v6" in kind:
        budget, vmem_limit = 24 << 20, 32 << 20          # v6e: 128 MiB physical
    elif ("v7" in kind) or ("7x" in kind):
        budget, vmem_limit, num_splits = 20 << 20, 32 << 20, 2   # v7x: 2 TCs, 64 MiB VMEM
    elif ("v4" in kind) or ("v5p" in kind) or ("v5" in kind):
        budget, vmem_limit = 24 << 20, 32 << 20

    # Clamp against physical VMEM when the query is available (defensive).
    try:
        cap = getattr(pltpu.get_tpu_info(), "vmem_capacity_bytes", None)
        if cap:
            half = cap // 2
            vmem_limit = half if vmem_limit is None else min(vmem_limit, half)
            budget = max(2 << 20, min(budget, half - (4 << 20)))
    except Exception:
        pass

    return {"budget": budget, "vmem_limit": vmem_limit, "num_splits": num_splits}


def _pick_tile_n(n, c, isz_pred, isz_knn, budget):
    # Per-row VMEM footprint:
    #  * 2 pipeline buffers for each (tile_n, C) input in its wire dtype
    #  * 2 lane-padded (tile_n, 1)->(tile_n, 128) int32 target buffers
    #  * ~4 live f32/bf16 (tile_n, C) temporaries (upcasts, exp, hi/lo splits)
    #  * ~8 live lane-padded (tile_n, <=128) f32 row vectors / MXU outputs
    per_row = (2 * c * (int(isz_pred) + int(isz_knn))
               + 2 * _LANES * 4
               + 4 * c * 4
               + 8 * _LANES * 4)
    t = max(_SUBLANES, budget // per_row)
    t -= t % _SUBLANES
    t = max(t, _SUBLANES)
    return n if n <= t else t


def knn_focal_like_loss(pred_logits, knn_logits, targets, coeff, *, tile_n=None):
    """pred_logits, knn_logits: [N, C] float (f32 or bf16); targets: [N] int; coeff: gamma."""
    n, c = pred_logits.shape
    gamma_arr = jnp.asarray(coeff, jnp.float32).reshape(1, 1)
    tgt2d = targets.astype(jnp.int32).reshape(n, 1)

    cfg = _device_config()
    isz_p = jnp.dtype(pred_logits.dtype).itemsize
    isz_k = jnp.dtype(knn_logits.dtype).itemsize

    if tile_n is None:
        tile_n = _pick_tile_n(n, c, isz_p, isz_k, cfg["budget"])
    if tile_n >= n:
        tile_n = n
    else:
        tile_n = max(_SUBLANES, tile_n - tile_n % _SUBLANES)

    n_tiles = pl.cdiv(n, tile_n)

    def run(num_splits, core_parallel):
        tiles_per_split = pl.cdiv(n_tiles, num_splits)

        # Deeper pipelining when blocks are small and the stream is long.
        block_bytes = tile_n * c * max(isz_p, isz_k)
        n_buf = 3 if (tiles_per_split >= 4 and block_bytes <= (1 << 20)) else 2

        def make_input_spec(shape, imap):
            if n_buf != 2:
                return pl.BlockSpec(shape, imap, pipeline_mode=pl.Buffered(n_buf))
            return pl.BlockSpec(shape, imap)

        if num_splits > 1:
            def row_map(p, j):
                # Clamp duplicated trailing tiles; their rows are masked in-kernel.
                return (jnp.minimum(p * tiles_per_split + j, n_tiles - 1), 0)
            grid = (num_splits, tiles_per_split)
            out_spec = pl.BlockSpec((_SUBLANES, _LANES), lambda p, j: (p, 0))
            sem = (pltpu.CORE_PARALLEL if core_parallel else pltpu.PARALLEL,
                   pltpu.ARBITRARY)
        else:
            def row_map(j):
                return (j, 0)
            grid = (n_tiles,)
            out_spec = pl.BlockSpec((_SUBLANES, _LANES), lambda j: (0, 0))
            sem = (pltpu.ARBITRARY,)

        kernel = functools.partial(
            _knn_focal_like_kernel,
            n_rows=n, tile_n=tile_n, tiles_per_split=tiles_per_split,
            num_splits=num_splits)

        cost = pl.CostEstimate(
            flops=2 * 8 * n * c * _LANES + 24 * n * c,
            transcendentals=n * c + 4 * n,
            bytes_accessed=n * c * (isz_p + isz_k) + n * 4
            + num_splits * _SUBLANES * _LANES * 4)

        cparams = {"dimension_semantics": sem}
        if cfg["vmem_limit"] is not None:
            cparams["vmem_limit_bytes"] = int(cfg["vmem_limit"])

        return pl.pallas_call(
            kernel,
            out_shape=jax.ShapeDtypeStruct((num_splits * _SUBLANES, _LANES),
                                           jnp.float32),
            grid=grid,
            in_specs=[
                pl.BlockSpec(memory_space=pltpu.SMEM),        # gamma (1,1)
                make_input_spec((tile_n, c), row_map),        # pred logits tile
                make_input_spec((tile_n, c), row_map),        # knn logits tile
                pl.BlockSpec((tile_n, 1), row_map),           # targets tile
            ],
            out_specs=out_spec,
            compiler_params=pltpu.CompilerParams(**cparams),
            cost_estimate=cost,
        )(gamma_arr, pred_logits, knn_logits, tgt2d)

    num_splits = cfg["num_splits"]
    if num_splits > 1:
        try:
            partials = run(num_splits, core_parallel=True)
        except Exception:
            # CORE_PARALLEL sharding unavailable -> fall back to one-core path.
            num_splits = 1
            partials = run(1, core_parallel=False)
    else:
        partials = run(1, core_parallel=False)

    per_split = partials.reshape(num_splits, _SUBLANES, _LANES)[:, 0, 0]
    return jnp.sum(per_split) / jnp.float32(n)


def _reference(pred_logits, knn_logits, targets, coeff):
    # pure-JAX reference mirroring the PyTorch module
    pred_logits = pred_logits.astype(jnp.float32)
    knn_logits = knn_logits.astype(jnp.float32)
    ce = -jax.nn.log_softmax(pred_logits, axis=-1)[
        jnp.arange(pred_logits.shape[0]), targets]
    p = knn_logits / jnp.sum(knn_logits, -1, keepdims=True)
    p_t = p[jnp.arange(knn_logits.shape[0]), targets]
    modulator = jnp.exp(coeff * jnp.log1p(-p_t))
    return jnp.sum(ce * modulator) / pred_logits.shape[0]


if __name__ == "__main__":
    key = jax.random.PRNGKey(0)
    k1, k2, k3 = jax.random.split(key, 3)

    TOL = dict(rtol=2e-5, atol=2e-5)

    # 1) small f32 case (single tile per split)
    N, C = 8, 32
    pred_logits = jax.random.normal(k1, (N, C), jnp.float32)
    knn_logits = jax.random.uniform(k2, (N, C), jnp.float32, minval=0.1, maxval=1.0)
    targets = jax.random.randint(k3, (N,), 0, C, jnp.int32)
    coeff = 2.0

    loss = knn_focal_like_loss(pred_logits, knn_logits, targets, coeff)
    jax.block_until_ready(loss)
    ref = _reference(pred_logits, knn_logits, targets, coeff)
    assert jnp.allclose(loss, ref, **TOL), (loss, ref)

    # 2) non-aligned batch with forced small tiles: exercises the multi-tile
    #    grid, partial-tile row masking, and the Buffered(3) pipeline path.
    N2, C2 = 37, 32
    pred2 = jax.random.normal(k1, (N2, C2), jnp.float32)
    knn2 = jax.random.uniform(k2, (N2, C2), jnp.float32, minval=0.1, maxval=1.0)
    tgt2 = jax.random.randint(k3, (N2,), 0, C2, jnp.int32)
    loss2 = knn_focal_like_loss(pred2, knn2, tgt2, 0.5, tile_n=8)
    jax.block_until_ready(loss2)
    ref2 = _reference(pred2, knn2, tgt2, 0.5)
    assert jnp.allclose(loss2, ref2, **TOL), (loss2, ref2)

    # 3) bf16 inputs on the wire (no wrapper-side f32 cast), f32 compute in-kernel.
    pred_bf = pred_logits.astype(jnp.bfloat16)
    knn_bf = knn_logits.astype(jnp.bfloat16)
    loss3 = knn_focal_like_loss(pred_bf, knn_bf, targets, coeff)
    jax.block_until_ready(loss3)
    ref3 = _reference(pred_bf, knn_bf, targets, coeff)
    assert jnp.allclose(loss3, ref3, **TOL), (loss3, ref3)

    print("KERNEL_OK")
</pallas_src>

<mosaic_0001>
module attributes {stable_mosaic.version = 11 : i64} {
  func.func @_knn_focal_like_kernel(%arg0: i32, %arg1: memref<1x1xf32, #tpu.memory_space<smem>>, %arg2: memref<8x32xf32, #tpu.memory_space<vmem>>, %arg3: memref<8x32xf32, #tpu.memory_space<vmem>>, %arg4: memref<8x1xi32, #tpu.memory_space<vmem>>, %arg5: memref<8x128xf32, #tpu.memory_space<vmem>>) attributes {dimension_semantics = [#tpu.dimension_semantics<arbitrary>], iteration_bounds = array<i64: 1>, scalar_prefetch = 0 : i64, scratch_operands = 0 : i64, tpu.core_type = #tpu.core_type<tc>, window_params = [{transform_indices = @transform_0, window_bounds = array<i64: 1, 1>}, {transform_indices = @transform_1, window_bounds = array<i64: 8, 32>}, {transform_indices = @transform_2, window_bounds = array<i64: 8, 32>}, {transform_indices = @transform_3, window_bounds = array<i64: 8, 1>}, {pipeline_mode = #tpu.pipeline_mode<synchronous>, transform_indices = @transform_4, window_bounds = array<i64: 8, 128>}]} {
    %c0_i32 = arith.constant 0 : i32
    %0 = arith.cmpi eq, %arg0, %c0_i32 : i32
    %1 = arith.extui %0 : i1 to i32
    %c0_i32_0 = arith.constant 0 : i32
    %2 = arith.cmpi ne, %1, %c0_i32_0 : i32
    scf.if %2 {
      %cst_30 = arith.constant 0.000000e+00 : f32
      %85 = vector.broadcast %cst_30 : f32 to vector<8x128xf32>
      %c0_31 = arith.constant 0 : index
      %c0_32 = arith.constant 0 : index
      %86 = vector.load %arg5[%c0_31, %c0_32] : memref<8x128xf32, #tpu.memory_space<vmem>>, vector<8x128xf32>
      tpu.vector_store %arg5[%c0_31, %c0_32], %85 {strides = array<i32>} : memref<8x128xf32, #tpu.memory_space<vmem>>, vector<8x128xf32>,
    } else {
    }
    %c0 = arith.constant 0 : index
    %c0_1 = arith.constant 0 : index
    %3 = vector.load %arg2[%c0, %c0_1] : memref<8x32xf32, #tpu.memory_space<vmem>>, vector<8x32xf32>
    %c0_2 = arith.constant 0 : index
    %c0_3 = arith.constant 0 : index
    %4 = vector.load %arg3[%c0_2, %c0_3] : memref<8x32xf32, #tpu.memory_space<vmem>>, vector<8x32xf32>
    %c0_4 = arith.constant 0 : index
    %c0_5 = arith.constant 0 : index
    %5 = vector.load %arg4[%c0_4, %c0_5] : memref<8x1xi32, #tpu.memory_space<vmem>>, vector<8x1xi32>
    %6 = tpu.iota {dimensions = array<i32: 1>} : vector<8x32xi32>
    %7 = vector.broadcast %5 : vector<8x1xi32> to vector<8x32xi32>
    %8 = arith.cmpi eq, %6, %7 : vector<8x32xi32>
    %cst = arith.constant dense<0xFF800000> : vector<8xf32>
    %9 = vector.multi_reduction <maximumf>, %3, %cst [1] : vector<8x32xf32> to vector<8xf32>
    %10 = vector.shape_cast %9 : vector<8xf32> to vector<8x1xf32>
    %cst_6 = arith.constant 1.000000e+00 : bf16
    %11 = vector.broadcast %cst_6 : bf16 to vector<32x128xbf16>
    %12 = vector.broadcast %10 : vector<8x1xf32> to vector<8x32xf32>
    %13 = arith.subf %3, %12 : vector<8x32xf32>
    %14 = math.exp %13 : vector<8x32xf32>
    %15 = arith.truncf %14 : vector<8x32xf32> to vector<8x32xbf16>
    %16 = arith.extf %15 : vector<8x32xbf16> to vector<8x32xf32>
    %17 = arith.subf %14, %16 : vector<8x32xf32>
    %18 = arith.truncf %17 : vector<8x32xf32> to vector<8x32xbf16>
    %19 = arith.truncf %3 : vector<8x32xf32> to vector<8x32xbf16>
    %20 = arith.extf %19 : vector<8x32xbf16> to vector<8x32xf32>
    %21 = arith.subf %3, %20 : vector<8x32xf32>
    %22 = arith.truncf %21 : vector<8x32xf32> to vector<8x32xbf16>
    %23 = arith.truncf %4 : vector<8x32xf32> to vector<8x32xbf16>
    %24 = arith.extf %23 : vector<8x32xbf16> to vector<8x32xf32>
    %25 = arith.subf %4, %24 : vector<8x32xf32>
    %26 = arith.truncf %25 : vector<8x32xf32> to vector<8x32xbf16>
    %cst_7 = arith.constant dense<0.000000e+00> : vector<8x128xf32>
    %27 = tpu.matmul %15, %11, %cst_7 {dimension_numbers = #tpu.dot_dimension_numbers<[1], [0], [0], [1], [0, 0, 1, 1], [], []>} : vector<8x32xbf16>, vector<32x128xbf16>, vector<8x128xf32> -> vector<8x128xf32>
    %cst_8 = arith.constant dense<0.000000e+00> : vector<8x128xf32>
    %28 = tpu.matmul %18, %11, %cst_8 {dimension_numbers = #tpu.dot_dimension_numbers<[1], [0], [0], [1], [0, 0, 1, 1], [], []>} : vector<8x32xbf16>, vector<32x128xbf16>, vector<8x128xf32> -> vector<8x128xf32>
    %29 = arith.addf %27, %28 : vector<8x128xf32>
    %30 = vector.extract_strided_slice %29 {offsets = [0, 0], sizes = [8, 1], strides = [1, 1]} : vector<8x128xf32> to vector<8x1xf32>
    %c0_i32_9 = arith.constant 0 : i32
    %31 = arith.sitofp %c0_i32_9 : i32 to bf16
    %32 = vector.broadcast %31 : bf16 to vector<8x32xbf16>
    %33 = arith.select %8, %19, %32 : vector<8x32xi1>, vector<8x32xbf16>
    %c0_i32_10 = arith.constant 0 : i32
    %34 = arith.sitofp %c0_i32_10 : i32 to bf16
    %35 = vector.broadcast %34 : bf16 to vector<8x32xbf16>
    %36 = arith.select %8, %22, %35 : vector<8x32xi1>, vector<8x32xbf16>
    %cst_11 = arith.constant dense<0.000000e+00> : vector<8x128xf32>
    %37 = tpu.matmul %33, %11, %cst_11 {dimension_numbers = #tpu.dot_dimension_numbers<[1], [0], [0], [1], [0, 0, 1, 1], [], []>} : vector<8x32xbf16>, vector<32x128xbf16>, vector<8x128xf32> -> vector<8x128xf32>
    %cst_12 = arith.constant dense<0.000000e+00> : vector<8x128xf32>
    %38 = tpu.matmul %36, %11, %cst_12 {dimension_numbers = #tpu.dot_dimension_numbers<[1], [0], [0], [1], [0, 0, 1, 1], [], []>} : vector<8x32xbf16>, vector<32x128xbf16>, vector<8x128xf32> -> vector<8x128xf32>
    %39 = arith.addf %37, %38 : vector<8x128xf32>
    %40 = vector.extract_strided_slice %39 {offsets = [0, 0], sizes = [8, 1], strides = [1, 1]} : vector<8x128xf32> to vector<8x1xf32>
    %c0_i32_13 = arith.constant 0 : i32
    %41 = arith.sitofp %c0_i32_13 : i32 to bf16
    %42 = vector.broadcast %41 : bf16 to vector<8x32xbf16>
    %43 = arith.select %8, %23, %42 : vector<8x32xi1>, vector<8x32xbf16>
    %c0_i32_14 = arith.constant 0 : i32
    %44 = arith.sitofp %c0_i32_14 : i32 to bf16
    %45 = vector.broadcast %44 : bf16 to vector<8x32xbf16>
    %46 = arith.select %8, %26, %45 : vector<8x32xi1>, vector<8x32xbf16>
    %cst_15 = arith.constant dense<0.000000e+00> : vector<8x128xf32>
    %47 = tpu.matmul %43, %11, %cst_15 {dimension_numbers = #tpu.dot_dimension_numbers<[1], [0], [0], [1], [0, 0, 1, 1], [], []>} : vector<8x32xbf16>, vector<32x128xbf16>, vector<8x128xf32> -> vector<8x128xf32>
    %cst_16 = arith.constant dense<0.000000e+00> : vector<8x128xf32>
    %48 = tpu.matmul %46, %11, %cst_16 {dimension_numbers = #tpu.dot_dimension_numbers<[1], [0], [0], [1], [0, 0, 1, 1], [], []>} : vector<8x32xbf16>, vector<32x128xbf16>, vector<8x128xf32> -> vector<8x128xf32>
    %49 = arith.addf %47, %48 : vector<8x128xf32>
    %50 = vector.extract_strided_slice %49 {offsets = [0, 0], sizes = [8, 1], strides = [1, 1]} : vector<8x128xf32> to vector<8x1xf32>
    %cst_17 = arith.constant dense<0.000000e+00> : vector<8x128xf32>
    %51 = tpu.matmul %23, %11, %cst_17 {dimension_numbers = #tpu.dot_dimension_numbers<[1], [0], [0], [1], [0, 0, 1, 1], [], []>} : vector<8x32xbf16>, vector<32x128xbf16>, vector<8x128xf32> -> vector<8x128xf32>
    %cst_18 = arith.constant dense<0.000000e+00> : vector<8x128xf32>
    %52 = tpu.matmul %26, %11, %cst_18 {dimension_numbers = #tpu.dot_dimension_numbers<[1], [0], [0], [1], [0, 0, 1, 1], [], []>} : vector<8x32xbf16>, vector<32x128xbf16>, vector<8x128xf32> -> vector<8x128xf32>
    %53 = arith.addf %51, %52 : vector<8x128xf32>
    %54 = vector.extract_strided_slice %53 {offsets = [0, 0], sizes = [8, 1], strides = [1, 1]} : vector<8x128xf32> to vector<8x1xf32>
    %55 = math.log %30 : vector<8x1xf32>
    %56 = arith.addf %10, %55 : vector<8x1xf32>
    %57 = arith.subf %56, %40 : vector<8x1xf32>
    %58 = tpu.reciprocal %54 : vector<8x1xf32> -> vector<8x1xf32>
    %59 = arith.mulf %50, %58 : vector<8x1xf32>
    %c0_19 = arith.constant 0 : index
    %c0_20 = arith.constant 0 : index
    %60 = memref.load %arg1[%c0_19, %c0_20] : memref<1x1xf32, #tpu.memory_space<smem>>
    %cst_21 = arith.constant 0.000000e+00 : f32
    %61 = vector.broadcast %cst_21 : f32 to vector<8x1xf32>
    %62 = arith.subf %61, %59 : vector<8x1xf32>
    %63 = math.log1p %62 : vector<8x1xf32>
    %64 = vector.broadcast %60 : f32 to vector<8x1xf32>
    %65 = arith.mulf %64, %63 : vector<8x1xf32>
    %66 = math.exp %65 : vector<8x1xf32>
    %c0_i32_22 = arith.constant 0 : i32
    %67 = arith.addi %c0_i32_22, %arg0 : i32
    %c8_i32 = arith.constant 8 : i32
    %68 = arith.muli %67, %c8_i32 : i32
    %69 = tpu.iota {dimensions = array<i32: 0>} : vector<8x1xi32>
    %70 = vector.broadcast %68 : i32 to vector<8x1xi32>
    %71 = arith.addi %70, %69 : vector<8x1xi32>
    %c8_i32_23 = arith.constant 8 : i32
    %72 = vector.broadcast %c8_i32_23 : i32 to vector<8x1xi32>
    %73 = arith.cmpi slt, %71, %72 : vector<8x1xi32>
    %74 = arith.mulf %57, %66 : vector<8x1xf32>
    %cst_24 = arith.constant 0.000000e+00 : f32
    %75 = vector.broadcast %cst_24 : f32 to vector<8x1xf32>
    %76 = arith.select %73, %74, %75 : vector<8x1xi1>, vector<8x1xf32>
    %c0_25 = arith.constant 0 : index
    %c0_26 = arith.constant 0 : index
    %77 = vector.load %arg5[%c0_25, %c0_26] : memref<8x128xf32, #tpu.memory_space<vmem>>, vector<8x128xf32>
    %78 = vector.shape_cast %76 : vector<8x1xf32> to vector<1x8x1xf32>
    %cst_27 = arith.constant dense<0.000000e+00> : vector<1xf32>
    %79 = vector.multi_reduction <add>, %78, %cst_27 [1, 2] : vector<1x8x1xf32> to vector<1xf32>
    %80 = vector.shape_cast %79 : vector<1xf32> to vector<1x1x1xf32>
    %81 = vector.extract %80[0, 0, 0] : f32 from vector<1x1x1xf32>
    %82 = vector.broadcast %81 : f32 to vector<8x128xf32>
    %83 = arith.addf %77, %82 : vector<8x128xf32>
    %c0_28 = arith.constant 0 : index
    %c0_29 = arith.constant 0 : index
    %84 = vector.load %arg5[%c0_28, %c0_29] : memref<8x128xf32, #tpu.memory_space<vmem>>, vector<8x128xf32>
    tpu.vector_store %arg5[%c0_28, %c0_29], %83 {strides = array<i32>} : memref<8x128xf32, #tpu.memory_space<vmem>>, vector<8x128xf32>,
    return
  }
  func.func @transform_0(%arg0: i32) -> (i32, i32) {
    %c0_i32 = arith.constant 0 : i32
    %c0_i32_0 = arith.constant 0 : i32
    %c0_i32_1 = arith.constant 0 : i32
    return %c0_i32, %c0_i32_0 : i32, i32
  }
  func.func @transform_1(%arg0: i32) -> (i32, i32) {
    %c0_i32 = arith.constant 0 : i32
    %c0_i32_0 = arith.constant 0 : i32
    return %arg0, %c0_i32 : i32, i32
  }
  func.func @transform_2(%arg0: i32) -> (i32, i32) {
    %c0_i32 = arith.constant 0 : i32
    %c0_i32_0 = arith.constant 0 : i32
    return %arg0, %c0_i32 : i32, i32
  }
  func.func @transform_3(%arg0: i32) -> (i32, i32) {
    %c0_i32 = arith.constant 0 : i32
    %c0_i32_0 = arith.constant 0 : i32
    return %arg0, %c0_i32 : i32, i32
  }
  func.func @transform_4(%arg0: i32) -> (i32, i32) {
    %c0_i32 = arith.constant 0 : i32
    %c0_i32_0 = arith.constant 0 : i32
    %c0_i32_1 = arith.constant 0 : i32
    return %c0_i32, %c0_i32_0 : i32, i32
  }
}

</mosaic_0001>

<bundles_post_ra>
// kernel: tpu_custom_call.1
= control target key start
LH: loop header
LB: loop body
LE: loop exit
PB: predicated region body
PF: predicated region fallthrough
CT: control target
= control target key end

     0   :  { %10 = vsyncpa [#allocation4], 0  ;;  %s752_s0 = inlined_call_operand.<no memory space> [shape: f32[1,1], index: 0, kind: input, shape index: {}]   ;;  %s753_s1 = inlined_call_operand.vmem [shape: f32[8,32], index: 1, kind: input, shape index: {}]   ;;  %s754_s2 = inlined_call_operand.hbm [shape: f32[8,32], index: 2, kind: input, shape index: {}]   ;;  %s755_s3 = inlined_call_operand.vmem [shape: s32[8,1], index: 3, kind: input, shape index: {}]   ;;  %s756_s4 = inlined_call_operand.hbm [shape: f32[8,128], index: 4, kind: output, shape index: {}]  }
   0x1   :  { %11 = vsyncpa [#allocation5], 0  ;;  %s633_s15 = smov [#allocation3]  }
   0x2   :  { %s22_s16 = sshll.u32 %s633_s15, 4  ;;  %s23_s16 = int_to_ptr.vmem [resolvable:$true] %s22_s16 }
   0x3   :  { %s597_s17 = scalar_lea.vmem %s23_s16, 128  ;;  %p602_p1 = scmp.lt.s32.totalorder %s23_s16, %s23_s16 }
   0x4   :  { %p598_p0 = scmp.ne.s32.totalorder %s23_s16, %s597_s17  ;;  %p603_p2 = scmp.lt.s32.totalorder %s597_s17, %s597_s17 }
   0x6   :  { %p604_p3 = por %p603_p2, %p602_p1 }
   0x8   :  { %p605_p4 = pnand %p604_p3, %p598_p0 }
   0xa   :  { %608 = shalt.err (!%p605_p4)
}
   0xb   :  { %25 = dma.hbm_to_vmem [thread:$0]  %s754_s2, 128, %s23_s16, [#allocation4]  }
   0xc   :  { %629 = dma.done.wait [#allocation4], 128  }
   0xd   :  { %630 = vsyncadd [#allocation4], 4294967168  ;;  %v634_v0 = vmov 0   ;;  %v635_v1 = vmov 0.0   ;;  %vm47_vm0 = vcmask 261120   ;;  %v38_v2 = vld [vmem:[%s753_s1] sm:$0xff]  ;;  %v41_v9 = vlaneseq }
   0xe   :  { %578 = vset.pattern.permute.xlu0 %v634_v0  ;;  %514 = vmatprep.subr.bf16.mxu1 %v635_v1  ;;  %v48_v3 = vsel %vm47_vm0, %v38_v2, -inf  ;;  %v636_v4 = vmov 1065369472   ;;  %vm637_vm1 = vmmov 0   ;;  %v40_v5 = vld [vmem:[%s755_s3] sm:$0xff]  ;;  %v58_v11 = vpack.c.bf16 %v38_v2, %v38_v2  ;;  %s638_s23 = smov [#allocation6]  }
   0xf   :  { %506 = vmatprep.subr.bf16.mxu0 %v635_v1  ;;  %49 = vmax.xlane.f32.xlu0 %v48_v3  ;;  %v42_v10 = vand.u32 127, %v41_v9  ;;  %v39_v17 = vld [vmem:[#allocation3] sm:$0xff]  ;;  %vm445_vm5 = vcmask 7168  }
  0x10   :  { %515 = vmatpush3.bf16.msra.mxu1 %v636_v4  ;;  %507 = vmatpush3.bf16.msra.mxu0 %v636_v4  ;;  %v59_v15 = vunpack.c.l.bf16 %v58_v11  ;;  %v62_v22 = vpack.c.bf16 %v39_v17, %v39_v17 }
  0x11   :  { %516 = vmatprep.subr.bf16.mxu1 %v635_v1  ;;  %518 = vmatprep.mubr.msk.bf16.mxu1 %vm637_vm1, %v635_v1 }
  0x12   :  { %508 = vmatprep.subr.bf16.mxu0 %v635_v1  ;;  %510 = vmatprep.mubr.msk.bf16.mxu0 %vm637_vm1, %v635_v1  ;;  %v60_v20 = vsub.f32 %v38_v2, %v59_v15  ;;  %v63_v25 = vunpack.c.l.bf16 %v62_v22 }
  0x14   :  { %517 = vmatpush3.bf16.msra.mxu1 %v636_v4  ;;  %509 = vmatpush3.bf16.msra.mxu0 %v636_v4  ;;  %v61_v24 = vpack.c.bf16 %v60_v20, %v60_v20  ;;  %v64_v27 = vsub.f32 %v39_v17, %v63_v25  ;;  %v432_v17 = vstv %s752_s0  ;;  %s465_s0 = sshll.u32 %s638_s23, 4  ;;  %s466_s0 = int_to_ptr.vmem [resolvable:$true] %s465_s0 }
  0x15   :  { %530 = vmatprep.subr.bf16.mxu1 %v635_v1  ;;  %522 = vmatprep.subr.bf16.mxu0 %v635_v1  ;;  %s609_s25 = scalar_lea.vmem %s466_s0, 128  ;;  %p614_p6 = scmp.lt.s32.totalorder %s466_s0, %s466_s0 }
  0x16   :  { %v65_v29 = vpack.c.bf16 %v64_v27, %v64_v27  ;;  %p610_p5 = scmp.ne.s32.totalorder %s466_s0, %s609_s25  ;;  %p615_p7 = scmp.lt.s32.totalorder %s609_s25, %s609_s25 }
  0x18   :  { %p616_p8 = por %p615_p7, %p614_p6 }
  0x1a   :  { %p617_p9 = pnand %p616_p8, %p610_p5 }
  0x25   :  { %44 = vperm.xlu0 %578, %v40_v5  }
  0x98   :  { %v688_v6 = vpop.xlane.xlu0 %49 }
  0x99   :  { %v51_v7 = vsub.f32 %v38_v2, %v688_v6 }
  0x9b   :  { %v52_v8 = vmul.f32 1.442695, %v51_v7 }
  0x9d   :  { %579 = vpow2.f32 %v52_v8 }
  0xa0   :  { %v45_v12 = vpop.permute.xlu0 %44 }
  0xa1   :  { %vm46_vm2 = vcmp.eq.s32.totalorder %v42_v10, %v45_v12 }
  0xa2   :  { %vm696_vm3 = vmpackc.low %vm46_vm2, %vm46_vm2 }
  0xa3   :  { %v153_v23 = vsel %vm696_vm3, %v58_v11, 0  ;;  %v154_v26 = vsel %vm696_vm3, %v61_v24, 0  ;;  %v241_v28 = vsel %vm696_vm3, %v62_v22, 0  ;;  %v242_v30 = vsel %vm696_vm3, %v65_v29, 0 }
  0xaa   :  { %v580_v13 = vpop.eup %579 }
  0xab   :  { %v54_v14 = vpack.c.bf16 %v580_v13, %v580_v13 }
  0xad   :  { %v55_v16 = vunpack.c.l.bf16 %v54_v14  ;;  %519 = vmatmul.mubr.msk.bf16.vlgmr.msra.gmra.mxu1 %vm47_vm0, %v54_v14 }
  0xae   :  { %531 = vmatpush3.bf16.msra.mxu1 %v636_v4  ;;  %534 = vmatprep.mubr.msk.bf16.mxu1 %vm637_vm1, %v635_v1 }
  0xaf   :  { %532 = vmatprep.subr.bf16.mxu1 %v635_v1  ;;  %v56_v19 = vsub.f32 %v580_v13, %v55_v16 }
  0xb1   :  { %v57_v21 = vpack.c.bf16 %v56_v19, %v56_v19 }
  0xb2   :  { %533 = vmatpush3.bf16.msra.mxu1 %v636_v4 }
  0xb3   :  { %511 = vmatmul.mubr.msk.bf16.vlgmr.msra.gmra.mxu0 %vm47_vm0, %v57_v21  ;;  %546 = vmatprep.subr.bf16.mxu1 %v635_v1 }
  0xb4   :  { %523 = vmatpush3.bf16.msra.mxu0 %v636_v4  ;;  %526 = vmatprep.mubr.msk.bf16.mxu0 %vm637_vm1, %v635_v1 }
  0xb5   :  { %535 = vmatmul.mubr.msk.bf16.vlgmr.msra.gmra.mxu1 %vm47_vm0, %v153_v23  ;;  %524 = vmatprep.subr.bf16.mxu0 %v635_v1 }
  0xb6   :  { %547 = vmatpush3.bf16.msra.mxu1 %v636_v4  ;;  %550 = vmatprep.mubr.msk.bf16.mxu1 %vm637_vm1, %v635_v1 }
  0xb7   :  { %548 = vmatprep.subr.bf16.mxu1 %v635_v1 }
  0xb8   :  { %525 = vmatpush3.bf16.msra.mxu0 %v636_v4 }
  0xb9   :  { %538 = vmatprep.subr.bf16.mxu0 %v635_v1 }
  0xba   :  { %549 = vmatpush3.bf16.msra.mxu1 %v636_v4 }
  0xbb   :  { %527 = vmatmul.mubr.msk.bf16.vlgmr.msra.gmra.mxu0 %vm47_vm0, %v154_v26  ;;  %562 = vmatprep.subr.bf16.mxu1 %v635_v1 }
  0xbc   :  { %539 = vmatpush3.bf16.msra.mxu0 %v636_v4  ;;  %542 = vmatprep.mubr.msk.bf16.mxu0 %vm637_vm1, %v635_v1 }
  0xbd   :  { %551 = vmatmul.mubr.msk.bf16.vlgmr.msra.gmra.mxu1 %vm47_vm0, %v241_v28  ;;  %540 = vmatprep.subr.bf16.mxu0 %v635_v1 }
  0xbe   :  { %563 = vmatpush3.bf16.msra.mxu1 %v636_v4  ;;  %566 = vmatprep.mubr.msk.bf16.mxu1 %vm637_vm1, %v635_v1 }
  0xbf   :  { %564 = vmatprep.subr.bf16.mxu1 %v635_v1 }
  0xc0   :  { %541 = vmatpush3.bf16.msra.mxu0 %v636_v4 }
  0xc1   :  { %554 = vmatprep.subr.bf16.mxu0 %v635_v1 }
  0xc2   :  { %565 = vmatpush3.bf16.msra.mxu1 %v636_v4 }
  0xc3   :  { %543 = vmatmul.mubr.msk.bf16.vlgmr.msra.gmra.mxu0 %vm47_vm0, %v242_v30 }
  0xc4   :  { %555 = vmatpush3.bf16.msra.mxu0 %v636_v4  ;;  %558 = vmatprep.mubr.msk.bf16.mxu0 %vm637_vm1, %v635_v1 }
  0xc5   :  { %567 = vmatmul.mubr.msk.bf16.vlgmr.msra.gmra.mxu1 %vm47_vm0, %v62_v22  ;;  %556 = vmatprep.subr.bf16.mxu0 %v635_v1 }
  0xc8   :  { %557 = vmatpush3.bf16.msra.mxu0 %v636_v4 }
  0xcb   :  { %559 = vmatmul.mubr.msk.bf16.vlgmr.msra.gmra.mxu0 %vm47_vm0, %v65_v29 }
 0x16d   :  { %v146_v31 = vpop.f32.mrf.mxu1 }
 0x16f   :  { %v520_v32 = vpop.f32.mrf.mxu1 }
 0x171   :  { %v149_v33 = vpop.f32.mrf.mxu1 }
 0x173   :  { %v103_v34 = vpop.f32.mrf.mxu0  ;;  %v521_v35 = vpop.f32.mrf.mxu1 }
 0x174   :  { %v147_v36 = vadd.f32 %v146_v31, %v103_v34 }
 0x175   :  { %v512_v37 = vpop.f32.mrf.mxu0  ;;  %v235_v38 = vpop.f32.mrf.mxu1 }
 0x176   :  { %581 = vlog2.f32 %v147_v36 }
 0x177   :  { %v106_v39 = vpop.f32.mrf.mxu0  ;;  %v536_v40 = vpop.f32.mrf.mxu1 }
 0x179   :  { %v513_v41 = vpop.f32.mrf.mxu0  ;;  %v238_v42 = vpop.f32.mrf.mxu1 }
 0x17b   :  { %v192_v43 = vpop.f32.mrf.mxu0  ;;  %v537_v44 = vpop.f32.mrf.mxu1 }
 0x17c   :  { %v236_v45 = vadd.f32 %v235_v38, %v192_v43 }
 0x17d   :  { %v528_v46 = vpop.f32.mrf.mxu0  ;;  %v323_v47 = vpop.f32.mrf.mxu1 }
 0x17f   :  { %v195_v48 = vpop.f32.mrf.mxu0  ;;  %v552_v49 = vpop.f32.mrf.mxu1 }
 0x181   :  { %v529_v50 = vpop.f32.mrf.mxu0  ;;  %v326_v51 = vpop.f32.mrf.mxu1 }
 0x183   :  { %v582_v52 = vpop.eup %581  ;;  %v280_v53 = vpop.f32.mrf.mxu0 }
 0x184   :  { %v553_v54 = vpop.f32.mrf.mxu1  ;;  %v416_v55 = vmul.f32 0.6931472, %v582_v52  ;;  %v324_v7 = vadd.f32 %v323_v47, %v280_v53 }
 0x185   :  { %v544_v56 = vpop.f32.mrf.mxu0 }
 0x186   :  { %v409_v57 = vpop.f32.mrf.mxu1  ;;  %v417_v58 = vadd.f32 %v416_v55, %v688_v6 }
 0x187   :  { %v283_v59 = vpop.f32.mrf.mxu0 }
 0x188   :  { %v568_v60 = vpop.f32.mrf.mxu1  ;;  %v418_v61 = vsub.f32 %v417_v58, %v236_v45 }
 0x189   :  { %v545_v62 = vpop.f32.mrf.mxu0 }
 0x18a   :  { %v412_v63 = vpop.f32.mrf.mxu1 }
 0x18b   :  { %v366_v0 = vpop.f32.mrf.mxu0 }
 0x18c   :  { %v569_v1 = vpop.f32.mrf.mxu1  ;;  %v410_v2 = vadd.f32 %v409_v57, %v366_v0 }
 0x18d   :  { %v560_v3 = vpop.f32.mrf.mxu0 }
 0x18e   :  { %583 = vrcp.f32 %v410_v2 }
 0x18f   :  { %v369_v4 = vpop.f32.mrf.mxu0 }
 0x191   :  { %v561_v5 = vpop.f32.mrf.mxu0 }
 0x19b   :  { %v584_v8 = vpop.eup %583 }
 0x19c   :  { %v420_v9 = vmul.f32 %v584_v8, %v324_v7 }
 0x19e   :  { %v422_v10 = vsub.f32 0.0, %v420_v9 }
 0x1a0   :  { %v423_v11 = vadd.f32 1.0, %v422_v10  ;;  %v426_v12 = vmul.f32 -0.5, %v422_v10  ;;  %v429_v13 = vand.u32 2147483647, %v422_v10 }
 0x1a2   :  { %585 = vlog2.f32 %v423_v11  ;;  %v427_v6 = vadd.f32 1.0, %v426_v12  ;;  %vm430_vm4 = vcmp.lt.f32.partialorder %v429_v13, 0.0004427343 }
 0x1a4   :  { %v428_v16 = vmul.f32 %v427_v6, %v422_v10 }
 0x1af   :  { %v586_v14 = vpop.eup %585 }
 0x1b0   :  { %v425_v15 = vmul.f32 0.6931472, %v586_v14 }
 0x1b2   :  { %v431_v18 = vsel %vm430_vm4, %v428_v16, %v425_v15 }
 0x1b3   :  { %v433_v19 = vmul.f32 %v432_v17, %v431_v18 }
 0x1b5   :  { %v434_v20 = vmul.f32 1.442695, %v433_v19 }
 0x1b7   :  { %587 = vpow2.f32 %v434_v20 }
 0x1c4   :  { %v588_v21 = vpop.eup %587 }
 0x1c5   :  { %v442_v22 = vmul.f32 %v588_v21, %v418_v61 }
 0x1c7   :  { %v446_v23 = vsel %vm445_vm5, %v442_v22, 0.0 }
 0x1c8   :  { %447 = vadd.xlane.f32.xlu1 %v446_v23 }
 0x251   :  { %v448_v24 = vpop.xlane.xlu1 %447 }
 0x252   :  { %v449_v25 = vrot.slane %v448_v24, 4 }
 0x254   :  { %v450_v26 = vadd.f32 %v449_v25, %v448_v24 }
 0x256   :  { %v451_v27 = vrot.slane %v450_v26, 2 }
 0x258   :  { %v452_v28 = vadd.f32 %v451_v27, %v450_v26 }
 0x25a   :  { %v453_v29 = vrot.slane %v452_v28, 1 }
 0x25c   :  { %v454_v30 = vadd.f32 %v453_v29, %v452_v28 }
 0x25e   :  { %570 = vpush %v454_v30 }
 0x28f   :  { %s571_s24 = spop %570 }
 0x290   :  { %v456_v31 = vstv %s571_s24 }
 0x291   :  { %458 = vst [vmem:[#allocation6] sm:$0xff] %v456_v31 }
 0x292   :  { %620 = shalt.err (!%p617_p9)
}
 0x293   :  { %468 = dma.vmem_to_hbm [thread:$0]  %s466_s0, 128, %s756_s4, [#allocation5]  }
 0x294   :  { %631 = dma.done.wait [#allocation5], 128  }
 0x295   :  { %632 = vsyncadd [#allocation5], 4294967168 }
 0x296   :  { %472 = vsyncpa [#allocation4], 1 }
 0x297   :  { %473 = vsyncpa [#allocation5], 1 }

</bundles_post_ra>
